<compile_context>
chip_gen: v6e
topology: v6e:2x2x1
jax: 0.10.0
libtpu: 0.0.40
codegen_flags: <defaults>
</compile_context>

<pallas_src>
import functools

import jax
import jax.numpy as jnp
from jax.experimental import pallas as pl
from jax.experimental.pallas import tpu as pltpu

NUM_INPUTS = 4          # CartPole-v0 observation dim
NUM_OUTPUTS = 2         # CartPole-v0 action dim
HIDDEN = 128
IN_PAD = 8              # feature dim padded to a full fp32 sublane (col 4 = 1.0 bias coord)
HEAD2_OUT = 128         # lane-padded width of the fused (adv|val) output layer
SUBLANE = 8
LANE = 128
DEFAULT_BLOCK_B = 4096  # batch tile; ~18 MiB/step VMEM, fits every generation


def _round_up(x, m):
    return ((x + m - 1) // m) * m


def dueling_dqn_kernel(x_ref, wf_ref, w1_ref, b1_ref, w2_ref, b2_ref,
                       q_ref, advsum_ref, *, batch_size, block_rows):
    x = x_ref[...]

    # feature: Linear(in,128) + ReLU. Bias is folded into wf via the
    # homogeneous coordinate (x[:, NUM_INPUTS] == 1, wf[NUM_INPUTS, :] == bf).
    h = jnp.maximum(
        jnp.dot(x, wf_ref[...], preferred_element_type=jnp.float32), 0.0)

    # fused hidden heads: [advantage_hidden | value_hidden] = ReLU(h @ (128,256))
    y = jnp.maximum(
        jnp.dot(h.astype(w1_ref.dtype), w1_ref[...],
                preferred_element_type=jnp.float32) + b1_ref[...], 0.0)

    # fused output heads via a block-diagonal (256,128) weight:
    #   cols [0, NUM_OUTPUTS)  -> advantage (fed by y[:, :128])
    #   col   NUM_OUTPUTS      -> value     (fed by y[:, 128:])
    #   remaining cols are zero padding (lane-dense MXU result).
    # (On v5e only: if profiling ever shows the MXU saturating, this padded
    #  matmul could be replaced by 3 VPU reductions — not worth it on v6e/v7x.)
    z = jnp.dot(y.astype(w2_ref.dtype), w2_ref[...],
                preferred_element_type=jnp.float32) + b2_ref[...]

    adv = z[:, :NUM_OUTPUTS]
    val = z[:, NUM_OUTPUTS:NUM_OUTPUTS + 1]

    # Per-row Q values (global mean(adv) subtracted in the wrapper).
    q_ref[...] = val + adv

    # Masked per-tile partial sum of advantage: padded batch rows are excluded
    # (zero-padded rows still produce nonzero activations through the biases).
    row_start = pl.program_id(0) * block_rows
    rows = jax.lax.broadcasted_iota(jnp.int32, (block_rows, 1), 0) + row_start
    partial = jnp.sum(jnp.where(rows < batch_size, adv, 0.0))
    # Lane-dense (8,128) block -> unmasked stores; wrapper reads element [0,0].
    advsum_ref[...] = jnp.broadcast_to(partial, advsum_ref.shape).astype(jnp.float32)


def dueling_dqn_forward(x, packed_params, *, block_b=DEFAULT_BLOCK_B):
    """x: (B, NUM_INPUTS) float32. Returns (B, NUM_OUTPUTS) float32 Q-values."""
    wf, w1, b1, w2, b2 = packed_params
    B = x.shape[0]
    dtype = wf.dtype

    kind = jax.devices()[0].device_kind.lower()
    is_v7 = "v7" in kind

    # Pad batch to a sublane multiple, then to a multiple of the batch tile.
    b_pad = _round_up(max(B, SUBLANE), SUBLANE)
    tb = min(_round_up(block_b, SUBLANE), b_pad)
    if is_v7 and b_pad >= 2 * SUBLANE:
        # Ensure >= 2 grid steps so CORE_PARALLEL can feed both TensorCores.
        tb = min(tb, _round_up((b_pad + 1) // 2, SUBLANE))
    b_pad = _round_up(b_pad, tb)
    num_tiles = b_pad // tb

    # Input: zero-pad, homogeneous coordinate 1.0 in column NUM_INPUTS (bias fold).
    x_p = jnp.zeros((b_pad, IN_PAD), dtype)
    x_p = x_p.at[:B, :NUM_INPUTS].set(x.astype(dtype))
    x_p = x_p.at[:, NUM_INPUTS].set(jnp.ones((), dtype))

    itemsize = lambda a: int(a.size) * jnp.dtype(a.dtype).itemsize
    flops = 2 * b_pad * (IN_PAD * HIDDEN + HIDDEN * 2 * HIDDEN
                         + 2 * HIDDEN * HEAD2_OUT)
    bytes_accessed = (itemsize(x_p)
                      + sum(itemsize(a) for a in (wf, w1, b1, w2, b2))
                      + b_pad * NUM_OUTPUTS * 4
                      + num_tiles * SUBLANE * LANE * 4)

    const = lambda i: (0, 0)     # weights/biases: VMEM-resident across steps
    grid_spec = pltpu.PrefetchScalarGridSpec(
        num_scalar_prefetch=0,
        grid=(num_tiles,),
        in_specs=[
            pl.BlockSpec((tb, IN_PAD), lambda i: (i, 0)),        # x tile
            pl.BlockSpec((IN_PAD, HIDDEN), const),               # wf (+ bias row)
            pl.BlockSpec((HIDDEN, 2 * HIDDEN), const),           # w1 fused
            pl.BlockSpec((1, 2 * HIDDEN), const),                # b1 fused
            pl.BlockSpec((2 * HIDDEN, HEAD2_OUT), const),        # w2 fused
            pl.BlockSpec((1, HEAD2_OUT), const),                 # b2 fused
        ],
        out_specs=[
            pl.BlockSpec((tb, NUM_OUTPUTS), lambda i: (i, 0)),   # Q = value + adv
            pl.BlockSpec((SUBLANE, LANE), lambda i: (i, 0)),     # per-tile adv sum
        ],
    )

    kernel = functools.partial(dueling_dqn_kernel, batch_size=B, block_rows=tb)
    # v7x has 64 MiB physical VMEM per TensorCore; v5e/v6e have 128 MiB.
    vmem_limit = (48 if is_v7 else 96) * 1024 * 1024

    def run(dims):
        return pl.pallas_call(
            kernel,
            out_shape=(
                jax.ShapeDtypeStruct((b_pad, NUM_OUTPUTS), jnp.float32),
                jax.ShapeDtypeStruct((num_tiles * SUBLANE, LANE), jnp.float32),
            ),
            grid_spec=grid_spec,
            compiler_params=pltpu.CompilerParams(
                dimension_semantics=dims,
                vmem_limit_bytes=vmem_limit,
            ),
            cost_estimate=pl.CostEstimate(flops=flops, transcendentals=0,
                                          bytes_accessed=bytes_accessed),
        )(x_p, wf, w1, b1, w2, b2)

    if is_v7 and num_tiles >= 2 and hasattr(pltpu, "CORE_PARALLEL"):
        # Only core_parallel actually shards grid steps across v7x's 2 TCs.
        try:
            q_raw, adv_part = run((pltpu.CORE_PARALLEL,))
        except Exception:          # pragma: no cover - conservative fallback
            q_raw, adv_part = run(("parallel",))
    else:
        q_raw, adv_part = run(("parallel",))

    # Finalize the GLOBAL scalar mean over (batch, actions) from the masked
    # per-tile partial sums (matches torch `advantage.mean()` with no dim).
    partials = adv_part.reshape(num_tiles, SUBLANE, LANE)[:, 0, 0]
    adv_mean = jnp.sum(partials) / (B * NUM_OUTPUTS)
    return q_raw[:B] - adv_mean


def init_params(key):
    """PyTorch-default Linear init (uniform(+-1/sqrt(fan_in))), stored
    transposed as (in_features, out_features) so the kernel computes x @ W + b."""
    def linear(key, fan_in, fan_out):
        kw, kb = jax.random.split(key)
        bound = 1.0 / jnp.sqrt(float(fan_in))
        w = jax.random.uniform(kw, (fan_in, fan_out), jnp.float32, -bound, bound)
        b = jax.random.uniform(kb, (1, fan_out), jnp.float32, -bound, bound)
        return w, b

    k = jax.random.split(key, 5)
    wf, bf = linear(k[0], NUM_INPUTS, HIDDEN)
    wa1, ba1 = linear(k[1], HIDDEN, HIDDEN)
    wa2, ba2 = linear(k[2], HIDDEN, NUM_OUTPUTS)
    wv1, bv1 = linear(k[3], HIDDEN, HIDDEN)
    wv2, bv2 = linear(k[4], HIDDEN, 1)
    return dict(wf=wf, bf=bf, wa1=wa1, ba1=ba1, wa2=wa2, ba2=ba2,
                wv1=wv1, bv1=bv1, wv2=wv2, bv2=bv2)


def pack_params(raw, compute_dtype=jnp.float32):
    """Pad + fuse the raw per-layer weights into the kernel layout.

    * wf is sublane-padded (4,128) -> (8,128); row NUM_INPUTS holds bf
      (homogeneous-coordinate bias fold; x provides a 1.0 in that column).
    * wa1|wv1 -> one (128, 256) weight, ba1|bv1 -> (1, 256).
    * wa2/wv2 -> one block-diagonal, lane-padded (256, 128) weight so both
      tiny output heads become a single MXU pass.
    Matmul operands are cast to `compute_dtype` (e.g. bfloat16 for v6e/v7x);
    layer-2/3 biases stay float32 and add onto the f32 MXU accumulators.
    """
    wf = jnp.zeros((IN_PAD, HIDDEN), jnp.float32)
    wf = wf.at[:NUM_INPUTS].set(raw["wf"])
    wf = wf.at[NUM_INPUTS].set(raw["bf"][0])                     # bias row

    w1 = jnp.concatenate([raw["wa1"], raw["wv1"]], axis=1)       # (128, 256)
    b1 = jnp.concatenate([raw["ba1"], raw["bv1"]], axis=1)       # (1, 256)

    w2 = jnp.zeros((2 * HIDDEN, HEAD2_OUT), jnp.float32)
    w2 = w2.at[:HIDDEN, :NUM_OUTPUTS].set(raw["wa2"])
    w2 = w2.at[HIDDEN:, NUM_OUTPUTS:NUM_OUTPUTS + 1].set(raw["wv2"])
    b2 = jnp.zeros((1, HEAD2_OUT), jnp.float32)
    b2 = b2.at[:, :NUM_OUTPUTS].set(raw["ba2"])
    b2 = b2.at[:, NUM_OUTPUTS:NUM_OUTPUTS + 1].set(raw["bv2"])

    return (wf.astype(compute_dtype),
            w1.astype(compute_dtype), b1,
            w2.astype(compute_dtype), b2)


def reference_forward(x, raw):
    h = jnp.maximum(x @ raw["wf"] + raw["bf"], 0.0)
    adv = jnp.maximum(h @ raw["wa1"] + raw["ba1"], 0.0) @ raw["wa2"] + raw["ba2"]
    val = jnp.maximum(h @ raw["wv1"] + raw["bv1"], 0.0) @ raw["wv2"] + raw["bv2"]
    return val + adv - jnp.mean(adv)


if __name__ == "__main__":
    key = jax.random.PRNGKey(0)
    k_params, k_x, k_x2, k_x3 = jax.random.split(key, 4)

    raw = init_params(k_params)
    # batch of 2 CartPole states, shape (2, 4)
    x = jax.random.normal(k_x, (2, NUM_INPUTS), jnp.float32)

    # float32 path: tight match against the pure-JAX reference.
    packed_f32 = pack_params(raw, jnp.float32)
    out = jax.block_until_ready(dueling_dqn_forward(x, packed_f32))
    ref = reference_forward(x, raw)
    assert out.shape == (2, NUM_OUTPUTS)
    assert jnp.allclose(out, ref, atol=1e-5, rtol=1e-5), (out, ref)

    # multi-tile grid path (batch spans several grid steps, with padding and
    # masked per-tile partial sums for the global mean).
    x_mid = jax.random.normal(k_x2, (300, NUM_INPUTS), jnp.float32)
    out_mid = jax.block_until_ready(
        dueling_dqn_forward(x_mid, packed_f32, block_b=128))
    ref_mid = reference_forward(x_mid, raw)
    assert out_mid.shape == (300, NUM_OUTPUTS)
    assert jnp.allclose(out_mid, ref_mid, atol=1e-4, rtol=1e-4)

    # larger batch through the default (4096-row) tile path.
    x_big = jax.random.normal(k_x3, (5000, NUM_INPUTS), jnp.float32)
    out_big = jax.block_until_ready(dueling_dqn_forward(x_big, packed_f32))
    ref_big = reference_forward(x_big, raw)
    assert out_big.shape == (5000, NUM_OUTPUTS)
    assert jnp.allclose(out_big, ref_big, atol=1e-3, rtol=1e-3)

    # bfloat16 operands on the MXU with float32 accumulation (v6e/v7x fast path).
    packed_bf16 = pack_params(raw, jnp.bfloat16)
    out_bf16 = jax.block_until_ready(dueling_dqn_forward(x, packed_bf16))
    assert jnp.allclose(out_bf16, ref, atol=1e-1, rtol=1e-1)

    print("KERNEL_OK")
</pallas_src>

<mosaic_0001>
module attributes {stable_mosaic.version = 11 : i64} {
  func.func @dueling_dqn_kernel(%arg0: i32, %arg1: memref<8x8xf32, #tpu.memory_space<vmem>>, %arg2: memref<8x128xf32, #tpu.memory_space<vmem>>, %arg3: memref<128x256xf32, #tpu.memory_space<vmem>>, %arg4: memref<1x256xf32, #tpu.memory_space<vmem>>, %arg5: memref<256x128xf32, #tpu.memory_space<vmem>>, %arg6: memref<1x128xf32, #tpu.memory_space<vmem>>, %arg7: memref<8x2xf32, #tpu.memory_space<vmem>>, %arg8: memref<8x128xf32, #tpu.memory_space<vmem>>) attributes {dimension_semantics = [#tpu.dimension_semantics<parallel>], iteration_bounds = array<i64: 1>, scalar_prefetch = 0 : i64, scratch_operands = 0 : i64, tpu.core_type = #tpu.core_type<tc>, window_params = [{transform_indices = @transform_0, window_bounds = array<i64: 8, 8>}, {pipeline_mode = #tpu.pipeline_mode<synchronous>, transform_indices = @transform_1, window_bounds = array<i64: 8, 128>}, {pipeline_mode = #tpu.pipeline_mode<synchronous>, transform_indices = @transform_2, window_bounds = array<i64: 128, 256>}, {pipeline_mode = #tpu.pipeline_mode<synchronous>, transform_indices = @transform_3, window_bounds = array<i64: 1, 256>}, {pipeline_mode = #tpu.pipeline_mode<synchronous>, transform_indices = @transform_4, window_bounds = array<i64: 256, 128>}, {pipeline_mode = #tpu.pipeline_mode<synchronous>, transform_indices = @transform_5, window_bounds = array<i64: 1, 128>}, {transform_indices = @transform_6, window_bounds = array<i64: 8, 2>}, {transform_indices = @transform_7, window_bounds = array<i64: 8, 128>}]} {
    %c0 = arith.constant 0 : index
    %c0_0 = arith.constant 0 : index
    %0 = vector.load %arg1[%c0, %c0_0] : memref<8x8xf32, #tpu.memory_space<vmem>>, vector<8x8xf32>
    %c0_1 = arith.constant 0 : index
    %c0_2 = arith.constant 0 : index
    %1 = vector.load %arg2[%c0_1, %c0_2] : memref<8x128xf32, #tpu.memory_space<vmem>>, vector<8x128xf32>
    %cst = arith.constant dense<0.000000e+00> : vector<8x128xf32>
    %2 = tpu.matmul %0, %1, %cst {dimension_numbers = #tpu.dot_dimension_numbers<[1], [0], [0], [1], [0, 0, 1, 1], [], []>} : vector<8x8xf32>, vector<8x128xf32>, vector<8x128xf32> -> vector<8x128xf32>
    %cst_3 = arith.constant 0.000000e+00 : f32
    %3 = vector.broadcast %cst_3 : f32 to vector<8x128xf32>
    %4 = arith.maximumf %2, %3 : vector<8x128xf32>
    %c0_4 = arith.constant 0 : index
    %c0_5 = arith.constant 0 : index
    %5 = vector.load %arg3[%c0_4, %c0_5] : memref<128x256xf32, #tpu.memory_space<vmem>>, vector<128x256xf32>
    %cst_6 = arith.constant dense<0.000000e+00> : vector<8x256xf32>
    %6 = tpu.matmul %4, %5, %cst_6 {dimension_numbers = #tpu.dot_dimension_numbers<[1], [0], [0], [1], [0, 0, 1, 1], [], []>} : vector<8x128xf32>, vector<128x256xf32>, vector<8x256xf32> -> vector<8x256xf32>
    %c0_7 = arith.constant 0 : index
    %c0_8 = arith.constant 0 : index
    %7 = vector.load %arg4[%c0_7, %c0_8] : memref<1x256xf32, #tpu.memory_space<vmem>>, vector<1x256xf32>
    %8 = vector.broadcast %7 : vector<1x256xf32> to vector<8x256xf32>
    %9 = arith.addf %6, %8 : vector<8x256xf32>
    %cst_9 = arith.constant 0.000000e+00 : f32
    %10 = vector.broadcast %cst_9 : f32 to vector<8x256xf32>
    %11 = arith.maximumf %9, %10 : vector<8x256xf32>
    %c0_10 = arith.constant 0 : index
    %c0_11 = arith.constant 0 : index
    %12 = vector.load %arg5[%c0_10, %c0_11] : memref<256x128xf32, #tpu.memory_space<vmem>>, vector<256x128xf32>
    %cst_12 = arith.constant dense<0.000000e+00> : vector<8x128xf32>
    %13 = tpu.matmul %11, %12, %cst_12 {dimension_numbers = #tpu.dot_dimension_numbers<[1], [0], [0], [1], [0, 0, 1, 1], [], []>} : vector<8x256xf32>, vector<256x128xf32>, vector<8x128xf32> -> vector<8x128xf32>
    %c0_13 = arith.constant 0 : index
    %c0_14 = arith.constant 0 : index
    %14 = vector.load %arg6[%c0_13, %c0_14] : memref<1x128xf32, #tpu.memory_space<vmem>>, vector<1x128xf32>
    %15 = vector.broadcast %14 : vector<1x128xf32> to vector<8x128xf32>
    %16 = arith.addf %13, %15 : vector<8x128xf32>
    %17 = vector.extract_strided_slice %16 {offsets = [0, 0], sizes = [8, 2], strides = [1, 1]} : vector<8x128xf32> to vector<8x2xf32>
    %18 = vector.extract_strided_slice %16 {offsets = [0, 2], sizes = [8, 1], strides = [1, 1]} : vector<8x128xf32> to vector<8x1xf32>
    %19 = vector.broadcast %18 : vector<8x1xf32> to vector<8x2xf32>
    %20 = arith.addf %19, %17 : vector<8x2xf32>
    %c0_15 = arith.constant 0 : index
    %c0_16 = arith.constant 0 : index
    %21 = vector.load %arg7[%c0_15, %c0_16] : memref<8x2xf32, #tpu.memory_space<vmem>>, vector<8x2xf32>
    tpu.vector_store %arg7[%c0_15, %c0_16], %20 {strides = array<i32>} : memref<8x2xf32, #tpu.memory_space<vmem>>, vector<8x2xf32>,
    %c8_i32 = arith.constant 8 : i32
    %22 = arith.muli %arg0, %c8_i32 : i32
    %23 = tpu.iota {dimensions = array<i32: 0>} : vector<8x1xi32>
    %24 = vector.broadcast %22 : i32 to vector<8x1xi32>
    %25 = arith.addi %23, %24 : vector<8x1xi32>
    %c2_i32 = arith.constant 2 : i32
    %26 = vector.broadcast %c2_i32 : i32 to vector<8x1xi32>
    %27 = arith.cmpi slt, %25, %26 : vector<8x1xi32>
    %cst_17 = arith.constant 0.000000e+00 : f32
    %28 = vector.shape_cast %27 : vector<8x1xi1> to vector<8x1xi1>
    %29 = vector.broadcast %28 : vector<8x1xi1> to vector<8x2xi1>
    %30 = vector.broadcast %cst_17 : f32 to vector<8x2xf32>
    %31 = arith.select %29, %17, %30 : vector<8x2xi1>, vector<8x2xf32>
    %32 = vector.shape_cast %31 : vector<8x2xf32> to vector<1x8x2xf32>
    %cst_18 = arith.constant dense<0.000000e+00> : vector<1xf32>
    %33 = vector.multi_reduction <add>, %32, %cst_18 [1, 2] : vector<1x8x2xf32> to vector<1xf32>
    %34 = vector.shape_cast %33 : vector<1xf32> to vector<1x1x1xf32>
    %35 = vector.extract %34[0, 0, 0] : f32 from vector<1x1x1xf32>
    %36 = vector.broadcast %35 : f32 to vector<8x128xf32>
    %c0_19 = arith.constant 0 : index
    %c0_20 = arith.constant 0 : index
    %37 = vector.load %arg8[%c0_19, %c0_20] : memref<8x128xf32, #tpu.memory_space<vmem>>, vector<8x128xf32>
    tpu.vector_store %arg8[%c0_19, %c0_20], %36 {strides = array<i32>} : memref<8x128xf32, #tpu.memory_space<vmem>>, vector<8x128xf32>,
    return
  }
  func.func @transform_0(%arg0: i32) -> (i32, i32) {
    %c0_i32 = arith.constant 0 : i32
    %c0_i32_0 = arith.constant 0 : i32
    return %arg0, %c0_i32 : i32, i32
  }
  func.func @transform_1(%arg0: i32) -> (i32, i32) {
    %c0_i32 = arith.constant 0 : i32
    %c0_i32_0 = arith.constant 0 : i32
    %c0_i32_1 = arith.constant 0 : i32
    return %c0_i32, %c0_i32_0 : i32, i32
  }
  func.func @transform_2(%arg0: i32) -> (i32, i32) {
    %c0_i32 = arith.constant 0 : i32
    %c0_i32_0 = arith.constant 0 : i32
    %c0_i32_1 = arith.constant 0 : i32
    return %c0_i32, %c0_i32_0 : i32, i32
  }
  func.func @transform_3(%arg0: i32) -> (i32, i32) {
    %c0_i32 = arith.constant 0 : i32
    %c0_i32_0 = arith.constant 0 : i32
    %c0_i32_1 = arith.constant 0 : i32
    return %c0_i32, %c0_i32_0 : i32, i32
  }
  func.func @transform_4(%arg0: i32) -> (i32, i32) {
    %c0_i32 = arith.constant 0 : i32
    %c0_i32_0 = arith.constant 0 : i32
    %c0_i32_1 = arith.constant 0 : i32
    return %c0_i32, %c0_i32_0 : i32, i32
  }
  func.func @transform_5(%arg0: i32) -> (i32, i32) {
    %c0_i32 = arith.constant 0 : i32
    %c0_i32_0 = arith.constant 0 : i32
    %c0_i32_1 = arith.constant 0 : i32
    return %c0_i32, %c0_i32_0 : i32, i32
  }
  func.func @transform_6(%arg0: i32) -> (i32, i32) {
    %c0_i32 = arith.constant 0 : i32
    %c0_i32_0 = arith.constant 0 : i32
    return %arg0, %c0_i32 : i32, i32
  }
  func.func @transform_7(%arg0: i32) -> (i32, i32) {
    %c0_i32 = arith.constant 0 : i32
    %c0_i32_0 = arith.constant 0 : i32
    return %arg0, %c0_i32 : i32, i32
  }
}

</mosaic_0001>

<bundles_post_ra>
// kernel: tpu_custom_call.1
= control target key start
LH: loop header
LB: loop body
LE: loop exit
PB: predicated region body
PF: predicated region fallthrough
CT: control target
= control target key end

     0   :  { %13 = vsyncpa [#allocation3], 0  ;;  %s673_s0 = inlined_call_operand.hbm [shape: f32[8,8], index: 0, kind: input, shape index: {}]   ;;  %s674_s1 = inlined_call_operand.hbm [shape: f32[8,128], index: 1, kind: input, shape index: {}]   ;;  %s675_s2 = inlined_call_operand.hbm [shape: f32[128,256], index: 2, kind: input, shape index: {}]   ;;  %s676_s3 = inlined_call_operand.vmem [shape: f32[1,256], index: 3, kind: input, shape index: {}]   ;;  %s677_s4 = inlined_call_operand.hbm [shape: f32[256,128], index: 4, kind: input, shape index: {}]   ;;  %s678_s5 = inlined_call_operand.vmem [shape: f32[1,128], index: 5, kind: input, shape index: {}]   ;;  %s679_s6 = inlined_call_operand.vmem [shape: f32[8,2], index: 6, kind: output, shape index: {0}]   ;;  %s680_s7 = inlined_call_operand.hbm [shape: f32[8,128], index: 7, kind: output, shape index: {1}]  }
   0x1   :  { %14 = vsyncpa [#allocation6], 0 }
   0x2   :  { %15 = vsyncpa [#allocation9], 0 }
   0x3   :  { %16 = vsyncpa [#allocation4], 0  ;;  %s597_s24 = smov [#allocation5]   ;;  %s598_s26 = smov [#allocation2]  }
   0x4   :  { %s33_s25 = sshll.u32 %s597_s24, 4  ;;  %s23_s27 = sshll.u32 %s598_s26, 4  ;;  %s34_s25 = int_to_ptr.vmem [resolvable:$true] %s33_s25  ;;  %s24_s27 = int_to_ptr.vmem [resolvable:$true] %s23_s27 }
   0x5   :  { %s497_s28 = scalar_lea.vmem %s34_s25, 128  ;;  %p502_p1 = scmp.lt.s32.totalorder %s34_s25, %s34_s25 }
   0x6   :  { %p498_p0 = scmp.ne.s32.totalorder %s34_s25, %s497_s28  ;;  %p503_p2 = scmp.lt.s32.totalorder %s497_s28, %s497_s28 }
   0x8   :  { %p504_p3 = por %p503_p2, %p502_p1 }
   0xa   :  { %p505_p4 = pnand %p504_p3, %p498_p0 }
   0xc   :  { %508 = shalt.err (!%p505_p4)
}
   0xd   :  { %36 = dma.hbm_to_vmem [thread:$0]  %s674_s1, 128, %s34_s25, [#allocation6]  }
   0xe   :  { %s517_s8 = scalar_lea.vmem %s24_s27, 128  ;;  %p522_p6 = scmp.lt.s32.totalorder %s24_s27, %s24_s27 }
   0xf   :  { %p518_p5 = scmp.ne.s32.totalorder %s24_s27, %s517_s8  ;;  %p523_p7 = scmp.lt.s32.totalorder %s517_s8, %s517_s8 }
  0x11   :  { %p524_p8 = por %p523_p7, %p522_p6 }
  0x13   :  { %p525_p9 = pnand %p524_p8, %p518_p5 }
  0x15   :  { %528 = shalt.err (!%p525_p9)
}
  0x16   :  { %26 = dma.hbm_to_vmem [thread:$0]  %s673_s0, 128, %s24_s27, [#allocation3]  }
  0x17   :  { %s599_s11 = smov [#allocation7]  }
  0x18   :  { %s42_s12 = sshll.u32 %s599_s11, 4  ;;  %s43_s12 = int_to_ptr.vmem [resolvable:$true] %s42_s12 }
  0x19   :  { %s537_s13 = scalar_lea.vmem %s43_s12, 4096  ;;  %p542_p11 = scmp.lt.s32.totalorder %s43_s12, %s43_s12 }
  0x1a   :  { %p538_p10 = scmp.ne.s32.totalorder %s43_s12, %s537_s13  ;;  %p543_p12 = scmp.lt.s32.totalorder %s537_s13, %s537_s13 }
  0x1c   :  { %p544_p13 = por %p543_p12, %p542_p11 }
  0x1e   :  { %p545_p0 = pnand %p544_p13, %p538_p10 }
  0x20   :  { %548 = shalt.err (!%p545_p0)
}
  0x21   :  { %s600_s1 = smov 256   ;;  %s601_s14 = smov 16  }
  0x22   :  { %48 = dma.hbm_to_vmem [thread:$0]  %s675_s2, 4096, %s43_s12, [#allocation6], %s600_s1, %s600_s1, %s601_s14  }
  0x23   :  { %s602_s17 = smov [#allocation8]  }
  0x24   :  { %s56_s18 = sshll.u32 %s602_s17, 4  ;;  %s57_s18 = int_to_ptr.vmem [resolvable:$true] %s56_s18 }
  0x25   :  { %s557_s0 = scalar_lea.vmem %s57_s18, 4096  ;;  %p562_p2 = scmp.lt.s32.totalorder %s57_s18, %s57_s18 }
  0x26   :  { %p558_p1 = scmp.ne.s32.totalorder %s57_s18, %s557_s0  ;;  %p563_p3 = scmp.lt.s32.totalorder %s557_s0, %s557_s0 }
  0x28   :  { %p564_p4 = por %p563_p3, %p562_p2 }
  0x2a   :  { %p565_p5 = pnand %p564_p4, %p558_p1 }
  0x2c   :  { %568 = shalt.err (!%p565_p5)
}
  0x2d   :  { %s603_s19 = smov 128   ;;  %s604_s20 = smov 8  }
  0x2e   :  { %62 = dma.hbm_to_vmem [thread:$0]  %s677_s4, 4096, %s57_s18, [#allocation9], %s603_s19, %s603_s19, %s604_s20  }
  0x2f   :  { %589 = dma.done.wait [#allocation3], 128  }
  0x30   :  { %590 = vsyncadd [#allocation3], 4294967168 }
  0x31   :  { %591 = dma.done.wait [#allocation6], 4224  }
  0x32   :  { %592 = vsyncadd [#allocation6], 4294963072 }
  0x33   :  { %593 = dma.done.wait [#allocation9], 4096  }
  0x34   :  { %594 = vsyncadd [#allocation9], 4294963200  ;;  %v605_v0 = vmov 0.0   ;;  %vm606_vm0 = vmmov 0   ;;  %vm79_vm1 = vcmask 64512   ;;  %v78_v1 = vld [vmem:[#allocation5] sm:$0xff] }
  0x35   :  { %469 = vmatprep.subr.mxu0 %v605_v0  ;;  %471 = vmatprep.mubr.msk.f32.mxu0 %vm606_vm0, %v605_v0  ;;  %v77_v2 = vld [vmem:[#allocation2] sm:$0xff]  ;;  %v185_v3 = vld [vmem:[#allocation7 + $0xf8] sm:$0xff]  ;;  %v183_v5 = vld [vmem:[#allocation7 + $0xe8] sm:$0xff]  ;;  %vm386_vm3 = vcmask 15360  }
  0x36   :  { %262 = vmatprep.mubr.f32.mxu1 %v605_v0  ;;  %470 = vmatpush3.msra.mxu0 %v78_v1  ;;  %v184_v4 = vld [vmem:[#allocation7 + $0xf0] sm:$0xff]  ;;  %v182_v6 = vld [vmem:[#allocation7 + $0xe0] sm:$0xff]  ;;  %v181_v7 = vld [vmem:[#allocation7 + $0xd8] sm:$0xff] }
  0x37   :  { %198 = vmatprep.subr.mxu1 %v185_v3  ;;  %472 = vmatmul.mubr.msk.f32.vlgmr.msra.gmra.mxu0 %vm79_vm1, %v77_v2  ;;  %v180_v8 = vld [vmem:[#allocation7 + $0xd0] sm:$0xff]  ;;  %v179_v9 = vld [vmem:[#allocation7 + $0xc8] sm:$0xff]  ;;  %v178_v10 = vld [vmem:[#allocation7 + $0xc0] sm:$0xff] }
  0x38   :  { %199 = vmatpush1.msra.mxu1 %v184_v4  ;;  %v177_v11 = vld [vmem:[#allocation7 + $0xb8] sm:$0xff]  ;;  %v176_v12 = vld [vmem:[#allocation7 + $0xb0] sm:$0xff]  ;;  %v175_v13 = vld [vmem:[#allocation7 + $0xa8] sm:$0xff] }
  0x39   :  { %200 = vmatprep.subr.mxu1 %v183_v5  ;;  %v174_v14 = vld [vmem:[#allocation7 + $0xa0] sm:$0xff]  ;;  %v173_v15 = vld [vmem:[#allocation7 + $0x98] sm:$0xff]  ;;  %v172_v16 = vld [vmem:[#allocation7 + $0x90] sm:$0xff] }
  0x3a   :  { %201 = vmatpush1.msra.mxu1 %v182_v6  ;;  %v171_v17 = vld [vmem:[#allocation7 + $0x88] sm:$0xff]  ;;  %v170_v18 = vld [vmem:[#allocation7 + $0x80] sm:$0xff]  ;;  %v169_v19 = vld [vmem:[#allocation7 + $0x78] sm:$0xff]  ;;  %v188_v6 = vlaneseq }
  0x3b   :  { %202 = vmatprep.subr.mxu1 %v181_v7  ;;  %v168_v20 = vld [vmem:[#allocation7 + $0x70] sm:$0xff]  ;;  %v167_v21 = vld [vmem:[#allocation7 + $0x68] sm:$0xff]  ;;  %v166_v22 = vld [vmem:[#allocation7 + $0x60] sm:$0xff] }
  0x3c   :  { %203 = vmatpush1.msra.mxu1 %v180_v8  ;;  %v165_v23 = vld [vmem:[#allocation7 + $0x58] sm:$0xff]  ;;  %v164_v24 = vld [vmem:[#allocation7 + $0x50] sm:$0xff]  ;;  %v163_v25 = vld [vmem:[#allocation7 + $0x48] sm:$0xff]  ;;  %v189_v7 = vshrl.u32 %v188_v6, 7 }
  0x3d   :  { %204 = vmatprep.subr.mxu1 %v179_v9  ;;  %v162_v26 = vld [vmem:[#allocation7 + $0x40] sm:$0xff]  ;;  %v161_v27 = vld [vmem:[#allocation7 + $0x38] sm:$0xff]  ;;  %v160_v28 = vld [vmem:[#allocation7 + $0x30] sm:$0xff] }
  0x3e   :  { %205 = vmatpush1.msra.mxu1 %v178_v10  ;;  %v159_v29 = vld [vmem:[#allocation7 + $0x28] sm:$0xff]  ;;  %v158_v30 = vld [vmem:[#allocation7 + $0x20] sm:$0xff]  ;;  %v157_v31 = vld [vmem:[#allocation7 + $0x18] sm:$0xff]  ;;  %v190_v8 = vsub.s32 0, %v189_v7  ;;  %v194_v10 = vsub.s32 1, %v189_v7  ;;  %vm393_vm2 = vcmp.lt.s32.totalorder %v189_v7, 2 }
  0x3f   :  { %206 = vmatprep.subr.mxu1 %v177_v11  ;;  %v156_v32 = vld [vmem:[#allocation7 + $0x10] sm:$0xff]  ;;  %v155_v33 = vld [vmem:[#allocation7 + $0x8] sm:$0xff]  ;;  %v154_v34 = vld [vmem:[#allocation7] sm:$0xff] }
  0x40   :  { %207 = vmatpush1.msra.mxu1 %v176_v12  ;;  %v302_v35 = vld [vmem:[#allocation8 + $0xf8] sm:$0xff]  ;;  %v301_v37 = vld [vmem:[#allocation8 + $0xf0] sm:$0xff]  ;;  %v300_v39 = vld [vmem:[#allocation8 + $0xe8] sm:$0xff] }
  0x41   :  { %208 = vmatprep.subr.mxu1 %v175_v13  ;;  %v286_v36 = vld [vmem:[#allocation8 + $0x78] sm:$0xff]  ;;  %434 = vmatprep.subr.mxu0 %v302_v35  ;;  %v285_v38 = vld [vmem:[#allocation8 + $0x70] sm:$0xff]  ;;  %v284_v40 = vld [vmem:[#allocation8 + $0x68] sm:$0xff] }
  0x42   :  { %209 = vmatpush1.msra.mxu1 %v174_v14  ;;  %435 = vmatpush3.msra.mxu0 %v286_v36  ;;  %v299_v41 = vld [vmem:[#allocation8 + $0xe0] sm:$0xff]  ;;  %v298_v43 = vld [vmem:[#allocation8 + $0xd8] sm:$0xff]  ;;  %v297_v45 = vld [vmem:[#allocation8 + $0xd0] sm:$0xff] }
  0x43   :  { %210 = vmatprep.subr.mxu1 %v173_v15  ;;  %436 = vmatprep.subr.mxu0 %v301_v37  ;;  %v283_v42 = vld [vmem:[#allocation8 + $0x60] sm:$0xff]  ;;  %v282_v44 = vld [vmem:[#allocation8 + $0x58] sm:$0xff]  ;;  %v281_v46 = vld [vmem:[#allocation8 + $0x50] sm:$0xff] }
  0x44   :  { %211 = vmatpush1.msra.mxu1 %v172_v16  ;;  %437 = vmatpush3.msra.mxu0 %v285_v38  ;;  %v296_v47 = vld [vmem:[#allocation8 + $0xc8] sm:$0xff]  ;;  %v295_v49 = vld [vmem:[#allocation8 + $0xc0] sm:$0xff]  ;;  %v294_v51 = vld [vmem:[#allocation8 + $0xb8] sm:$0xff] }
  0x45   :  { %212 = vmatprep.subr.mxu1 %v171_v17  ;;  %438 = vmatprep.subr.mxu0 %v300_v39  ;;  %v280_v48 = vld [vmem:[#allocation8 + $0x48] sm:$0xff]  ;;  %v279_v50 = vld [vmem:[#allocation8 + $0x40] sm:$0xff]  ;;  %v278_v52 = vld [vmem:[#allocation8 + $0x38] sm:$0xff] }
  0x46   :  { %213 = vmatpush1.msra.mxu1 %v170_v18  ;;  %439 = vmatpush3.msra.mxu0 %v284_v40  ;;  %v293_v53 = vld [vmem:[#allocation8 + $0xb0] sm:$0xff]  ;;  %v292_v55 = vld [vmem:[#allocation8 + $0xa8] sm:$0xff]  ;;  %v291_v57 = vld [vmem:[#allocation8 + $0xa0] sm:$0xff] }
  0x47   :  { %214 = vmatprep.subr.mxu1 %v169_v19  ;;  %440 = vmatprep.subr.mxu0 %v299_v41  ;;  %v277_v54 = vld [vmem:[#allocation8 + $0x30] sm:$0xff]  ;;  %v276_v56 = vld [vmem:[#allocation8 + $0x28] sm:$0xff]  ;;  %v275_v58 = vld [vmem:[#allocation8 + $0x20] sm:$0xff]  ;;  %v607_v19 = vmov 2  }
  0x48   :  { %215 = vmatpush1.msra.mxu1 %v168_v20  ;;  %441 = vmatpush3.msra.mxu0 %v283_v42  ;;  %v290_v62 = vld [vmem:[#allocation8 + $0x98] sm:$0xff]  ;;  %v289_v0 = vld [vmem:[#allocation8 + $0x90] sm:$0xff]  ;;  %v288_v2 = vld [vmem:[#allocation8 + $0x88] sm:$0xff] }
  0x49   :  { %216 = vmatprep.subr.mxu1 %v167_v21  ;;  %442 = vmatprep.subr.mxu0 %v298_v43  ;;  %v274_v63 = vld [vmem:[#allocation8 + $0x18] sm:$0xff]  ;;  %v273_v1 = vld [vmem:[#allocation8 + $0x10] sm:$0xff]  ;;  %v272_v3 = vld [vmem:[#allocation8 + $0x8] sm:$0xff] }
  0x4a   :  { %217 = vmatpush1.msra.mxu1 %v166_v22  ;;  %443 = vmatpush3.msra.mxu0 %v282_v44  ;;  %v287_v4 = vld [vmem:[#allocation8 + $0x80] sm:$0xff]  ;;  %v186_v9 = vld [vmem:[%s676_s3] sm:$0x3] }
  0x4b   :  { %218 = vmatprep.subr.mxu1 %v165_v23  ;;  %444 = vmatprep.subr.mxu0 %v297_v45  ;;  %v271_v5 = vld [vmem:[#allocation8] sm:$0xff]  ;;  %v191_v11 = vrot.slane %v186_v9, %v190_v8  ;;  %v195_v12 = vrot.slane %v186_v9, %v194_v10  ;;  %v431_v21 = vld [vmem:[%s678_s5] ss:$0 sm:$0xff]  ;;  %s608_s5 = smov [#allocation10]  }
  0x4c   :  { %219 = vmatpush1.msra.mxu1 %v164_v24  ;;  %445 = vmatpush3.msra.mxu0 %v281_v46  ;;  %s417_s26 = sshll.u32 %s608_s5, 4  ;;  %s418_s26 = int_to_ptr.vmem [resolvable:$true] %s417_s26 }
  0x4d   :  { %220 = vmatprep.subr.mxu1 %v163_v25  ;;  %446 = vmatprep.subr.mxu0 %v296_v47  ;;  %s569_s28 = scalar_lea.vmem %s418_s26, 128  ;;  %p574_p7 = scmp.lt.s32.totalorder %s418_s26, %s418_s26 }
  0x4e   :  { %221 = vmatpush1.msra.mxu1 %v162_v26  ;;  %447 = vmatpush3.msra.mxu0 %v280_v48  ;;  %p570_p6 = scmp.ne.s32.totalorder %s418_s26, %s569_s28  ;;  %p575_p8 = scmp.lt.s32.totalorder %s569_s28, %s569_s28 }
  0x4f   :  { %222 = vmatprep.subr.mxu1 %v161_v27  ;;  %448 = vmatprep.subr.mxu0 %v295_v49 }
  0x50   :  { %223 = vmatpush1.msra.mxu1 %v160_v28  ;;  %449 = vmatpush3.msra.mxu0 %v279_v50  ;;  %p576_p9 = por %p575_p8, %p574_p7 }
  0x51   :  { %224 = vmatprep.subr.mxu1 %v159_v29  ;;  %450 = vmatprep.subr.mxu0 %v294_v51 }
  0x52   :  { %225 = vmatpush1.msra.mxu1 %v158_v30  ;;  %451 = vmatpush3.msra.mxu0 %v278_v52  ;;  %p577_p10 = pnand %p576_p9, %p570_p6 }
  0x53   :  { %226 = vmatprep.subr.mxu1 %v157_v31  ;;  %452 = vmatprep.subr.mxu0 %v293_v53 }
  0x54   :  { %227 = vmatpush1.msra.mxu1 %v156_v32  ;;  %453 = vmatpush3.msra.mxu0 %v277_v54 }
  0x55   :  { %228 = vmatprep.subr.mxu1 %v155_v33  ;;  %454 = vmatprep.subr.mxu0 %v292_v55 }
  0x56   :  { %229 = vmatpush1.msra.mxu1 %v154_v34  ;;  %455 = vmatpush3.msra.mxu0 %v276_v56 }
  0x57   :  { %456 = vmatprep.subr.mxu0 %v291_v57  ;;  %488 = vset.pattern.permute.xlu0 %v607_v19 }
  0x58   :  { %457 = vmatpush3.msra.mxu0 %v275_v58 }
  0x59   :  { %458 = vmatprep.subr.mxu0 %v290_v62 }
  0x5a   :  { %459 = vmatpush3.msra.mxu0 %v274_v63 }
  0x5b   :  { %460 = vmatprep.subr.mxu0 %v289_v0 }
  0x5c   :  { %461 = vmatpush3.msra.mxu0 %v273_v1 }
  0x5d   :  { %462 = vmatprep.subr.mxu0 %v288_v2 }
  0x5e   :  { %463 = vmatpush3.msra.mxu0 %v272_v3 }
  0x5f   :  { %464 = vmatprep.subr.mxu0 %v287_v4 }
  0x60   :  { %465 = vmatpush3.msra.mxu0 %v271_v5 }
  0xf7   :  { %v149_v59 = vpop.f32.mrf.mxu0 }
  0xf8   :  { %v153_v60 = vmax.f32 %v149_v59, 0.0 }
  0xf9   :  { %v473_v61 = vpop.f32.mrf.mxu0 }
  0xfa   :  { %263 = vmatmul.mubr.f32.vlgmr.msra.gmra.mxu1 %v153_v60 }
 0x1ba   :  { %v264_v13 = vpop.f32.mrf.mxu1 }
 0x1bb   :  { %v265_v14 = vadd.f32 %v264_v13, %v191_v11 }
 0x1bc   :  { %v266_v15 = vpop.f32.mrf.mxu1 }
 0x1bd   :  { %v267_v16 = vadd.f32 %v266_v15, %v195_v12  ;;  %v269_v18 = vmax.f32 %v265_v14, 0.0 }
 0x1bf   :  { %v270_v17 = vmax.f32 %v267_v16, 0.0 }
 0x1c1   :  { %374 = vmatprep.mubr.f32.mxu0 %v270_v17 }
 0x1c2   :  { %375 = vmatmul.mubr.f32.vlgmr.msra.gmra.mxu0 %v269_v18 }
 0x282   :  { %v466_v20 = vpop.f32.mrf.mxu0 }
 0x284   :  { %v467_v22 = vpop.f32.mrf.mxu0 }
 0x285   :  { %v468_v23 = vadd.f32 %v467_v22, %v466_v20 }
 0x287   :  { %v377_v24 = vadd.f32 %v468_v23, %v431_v21 }
 0x289   :  { %v396_v25 = vsel %vm393_vm2, %v377_v24, 0.0 }
 0x28a   :  { %v397_v26 = vsel %vm386_vm3, %v396_v25, 0.0 }
 0x28b   :  { %398 = vadd.xlane.f32.xlu0 %v397_v26 }
 0x2a1   :  { %382 = vperm.xlu0 %488, %v377_v24  }
 0x314   :  { %v399_v27 = vpop.xlane.xlu0 %398 }
 0x315   :  { %v400_v28 = vrot.slane %v399_v27, 4 }
 0x317   :  { %v401_v29 = vadd.f32 %v400_v28, %v399_v27 }
 0x319   :  { %v402_v30 = vrot.slane %v401_v29, 2 }
 0x31b   :  { %v403_v31 = vadd.f32 %v402_v30, %v401_v29 }
 0x31c   :  { %v383_v32 = vpop.permute.xlu0 %382 }
 0x31d   :  { %v385_v33 = vadd.f32 %v383_v32, %v377_v24  ;;  %v404_v34 = vrot.slane %v403_v31, 1 }
 0x31f   :  { %387 = vst.msk [vmem:[%s679_s6] sm:$0xff] %vm386_vm3, %v385_v33  ;;  %v405_v35 = vadd.f32 %v404_v34, %v403_v31 }
 0x321   :  { %474 = vpush %v405_v35 }
 0x352   :  { %s475_s27 = spop %474 }
 0x353   :  { %v407_v36 = vstv %s475_s27 }
 0x354   :  { %408 = vst [vmem:[#allocation10] sm:$0xff] %v407_v36 }
 0x355   :  { %580 = shalt.err (!%p577_p10)
}
 0x356   :  { %420 = dma.vmem_to_hbm [thread:$0]  %s418_s26, 128, %s680_s7, [#allocation4]  }
 0x357   :  { %595 = dma.done.wait [#allocation4], 128  }
 0x358   :  { %596 = vsyncadd [#allocation4], 4294967168 }
 0x359   :  { %426 = vsyncpa [#allocation3], 1 }
 0x35a   :  { %427 = vsyncpa [#allocation6], 1 }
 0x35b   :  { %428 = vsyncpa [#allocation9], 1 }
 0x35c   :  { %429 = vsyncpa [#allocation4], 1 }

</bundles_post_ra>
